<compile_context>
chip_gen: v6e
topology: v6e:2x2x1
jax: 0.10.0
libtpu: 0.0.40
codegen_flags: <defaults>
</compile_context>

<pallas_src>
import functools

import jax
import jax.numpy as jnp
from jax import lax
from jax.experimental import pallas as pl
from jax.experimental.pallas import tpu as pltpu

EPS = 1e-5


def _round_up(x, m):
    return ((x + m - 1) // m) * m


def _stats_kernel(x_ref, sumx_ref, gram_ref, sumx_sc, gram_sc, *, hw, tiles_per_split):
    """Grid (splits, N, tiles_per_split).  x block (Squeezed, Cin, tile) -> kernel sees (Cin, tile).
    Accumulates sum_x and the Gram matrix x @ x^T in VMEM scratch; writes the per-(split, image)
    partials on the last tile step."""
    t = pl.program_id(2)

    @pl.when(t == 0)
    def _init():
        sumx_sc[...] = jnp.zeros_like(sumx_sc)
        gram_sc[...] = jnp.zeros_like(gram_sc)

    x = x_ref[...]                                      # (Cin, tile)
    tile = x.shape[-1]
    if hw % tile != 0:
        # The last tile of each image overruns H*W: Pallas clips the DMA, so the tail lanes hold
        # garbage -> mask them to zero before accumulating (they then contribute nothing).
        tile_idx = pl.program_id(0) * tiles_per_split + t
        lane = lax.broadcasted_iota(jnp.int32, x.shape, 1)
        x = jnp.where(tile_idx * tile + lane < hw, x, 0.0)

    sumx_sc[...] += jnp.sum(x, axis=1, keepdims=True)                      # (Cin, 1)
    gram_sc[...] += lax.dot_general(x, x, (((1,), (1,)), ((), ())),        # (Cin, Cin) on MXU
                                    preferred_element_type=jnp.float32)

    @pl.when(t == pl.num_programs(2) - 1)
    def _fin():
        sumx_ref[0, 0] = sumx_sc[...]
        gram_ref[0, 0] = gram_sc[...]


def _apply_kernel(x_ref, ws_ref, shift_ref, o_ref):
    """o = (w * scale) @ x + shift  — conv recomputed with the BN scale folded into the weight."""
    y = jnp.dot(ws_ref[...], x_ref[...], preferred_element_type=jnp.float32)   # (Cout, tile)
    o_ref[0] = (y + shift_ref[...]).astype(o_ref.dtype)


def _fused_kernel(x_ref, w_ref, gamma_ref, beta_ref, o_ref, *, m_total):
    """Single-invocation path: everything resident in VMEM, x read from HBM once,
    centred (numerically safer) batch variance."""
    x = x_ref[...]                                      # (N, Cin, HW)
    w = w_ref[...]                                      # (Cout, Cin)
    n = x.shape[0]
    wb = jnp.broadcast_to(w, (n,) + w.shape)            # (N, Cout, Cin) — tiny
    y = lax.dot_general(wb, x, (((2,), (1,)), ((0,), (0,))),
                        preferred_element_type=jnp.float32)                # (N, Cout, HW)
    mean = jnp.sum(jnp.sum(y, axis=2, keepdims=True), axis=0, keepdims=True) / m_total
    d = y - mean
    var = jnp.sum(jnp.sum(d * d, axis=2, keepdims=True), axis=0, keepdims=True) / m_total
    inv_std = lax.rsqrt(var + EPS)
    o_ref[...] = (d * (inv_std * gamma_ref[...]) + beta_ref[...]).astype(o_ref.dtype)


def linear_block_forward(x_nchw, conv_weight, gamma, beta, *, tile_hw=2048, allow_fused=True):
    """Forward pass of Linear_block (1x1 Conv2d, bias=False, groups=1 -> BatchNorm2d, training mode).

    x_nchw:      (N, Cin, H, W) float32
    conv_weight: (Cout, Cin, 1, 1) or (Cout, Cin)
    gamma, beta: (Cout,)
    """
    N, Cin, H, W = x_nchw.shape
    Cout = conv_weight.shape[0]
    HW = H * W
    M = N * HW

    x3 = x_nchw.reshape(N, Cin, HW).astype(jnp.float32)        # free view of contiguous NCHW
    w = conv_weight.reshape(Cout, Cin).astype(jnp.float32)
    gamma = gamma.astype(jnp.float32)
    beta = beta.astype(jnp.float32)

    try:
        vmem_cap = int(pltpu.get_tpu_info().vmem_capacity_bytes)
    except Exception:
        vmem_cap = 64 * 1024 * 1024                            # conservative (v7x per-core)

    # ---- Fused fast path: whole problem VMEM-resident, x read from HBM exactly once ----------
    fused_bytes = 4 * N * HW * (Cin + 3 * Cout) + 4 * (Cout * Cin + 4 * Cout)
    if allow_fused and fused_bytes <= vmem_cap // 3:
        vmem_limit = int(min(vmem_cap, max(32 << 20, 2 * fused_bytes + (4 << 20))))
        o3 = pl.pallas_call(
            functools.partial(_fused_kernel, m_total=M),
            out_shape=jax.ShapeDtypeStruct((N, Cout, HW), jnp.float32),
            compiler_params=pltpu.CompilerParams(vmem_limit_bytes=vmem_limit),
        )(x3, w, gamma.reshape(1, Cout, 1), beta.reshape(1, Cout, 1))
        return o3.reshape(N, Cout, H, W)

    # ---- Two-pass tiled path -----------------------------------------------------------------
    tile = max(128, min(_round_up(tile_hw, 128), _round_up(HW, 128)))
    n_tiles = pl.cdiv(HW, tile)
    # Give both TensorCores work in pass 1 even when N == 1 (v7x has 2 TCs; on single-core chips
    # the extra split is just one harmless tiny partial output).
    num_splits = 1 if N >= 2 else (2 if (n_tiles >= 2 and n_tiles % 2 == 0) else 1)
    tps = n_tiles // num_splits

    # Pass 1: per-(split, image) partial sum_x / Gram of x (y is never formed or written).
    sumx_p, gram_p = pl.pallas_call(
        functools.partial(_stats_kernel, hw=HW, tiles_per_split=tps),
        out_shape=(
            jax.ShapeDtypeStruct((num_splits, N, Cin, 1), jnp.float32),
            jax.ShapeDtypeStruct((num_splits, N, Cin, Cin), jnp.float32),
        ),
        grid_spec=pltpu.PrefetchScalarGridSpec(
            num_scalar_prefetch=0,
            grid=(num_splits, N, tps),
            in_specs=[
                pl.BlockSpec((pl.Squeezed(), Cin, tile),
                             lambda s, n, t, tps=tps: (n, 0, s * tps + t)),
            ],
            out_specs=(
                pl.BlockSpec((1, 1, Cin, 1), lambda s, n, t: (s, n, 0, 0)),
                pl.BlockSpec((1, 1, Cin, Cin), lambda s, n, t: (s, n, 0, 0)),
            ),
            scratch_shapes=[
                pltpu.VMEM((Cin, 1), jnp.float32),
                pltpu.VMEM((Cin, Cin), jnp.float32),
            ],
        ),
        compiler_params=pltpu.CompilerParams(
            dimension_semantics=("parallel", "parallel", "arbitrary")),
    )(x3)

    # ---- Tiny per-channel BN math (Cout/Cin scalars) stays in plain JAX ----
    sum_x = jnp.sum(sumx_p, axis=(0, 1, 3))                    # (Cin,)
    G = jnp.sum(gram_p, axis=(0, 1))                           # (Cin, Cin)
    sum_y = w @ sum_x                                          # (Cout,)
    sumsq_y = jnp.sum((w @ G) * w, axis=1)                     # diag(w G w^T), (Cout,)
    mean = sum_y / M
    # TODO(synk): uncentered E[y^2]-E[y]^2 in f32 can cancel when |mean| >> std; switch to a
    # centred second pass / pairwise accumulation if such activations ever show up here.
    var = jnp.maximum(sumsq_y / M - mean * mean, 0.0)          # biased variance (BN training mode)
    inv_std = lax.rsqrt(var + EPS)
    scale = gamma * inv_std
    shift = beta - mean * scale
    ws = w * scale[:, None]                                    # BN scale folded into conv weight
    shift_col = shift[:, None]                                 # (Cout, 1)

    # Pass 2: o = ws @ x + shift; lane-dense (N, Cout, HWp) output; fully parallel grid.
    HWp = n_tiles * tile
    o3p = pl.pallas_call(
        _apply_kernel,
        out_shape=jax.ShapeDtypeStruct((N, Cout, HWp), jnp.float32),
        grid_spec=pltpu.PrefetchScalarGridSpec(
            num_scalar_prefetch=0,
            grid=(N, n_tiles),
            in_specs=[
                pl.BlockSpec((pl.Squeezed(), Cin, tile), lambda n, t: (n, 0, t)),
                pl.BlockSpec((Cout, Cin), lambda n, t: (0, 0)),
                pl.BlockSpec((Cout, 1), lambda n, t: (0, 0)),
            ],
            out_specs=pl.BlockSpec((1, Cout, tile), lambda n, t: (n, 0, t)),
        ),
        compiler_params=pltpu.CompilerParams(
            dimension_semantics=("parallel", "parallel")),
    )(x3, ws, shift_col)
    # TODO(synk): sweep pipeline_mode=pl.Buffered(3) on the x BlockSpecs if grid steps stay short.

    o3 = o3p if HWp == HW else o3p[:, :, :HW]                  # tail-only slice
    return o3.reshape(N, Cout, H, W)


def _reference(x_nchw, conv_weight, gamma, beta):
    """Pure-JAX reference matching torch: 1x1 conv then BN (training mode, batch stats)."""
    w = conv_weight.reshape(conv_weight.shape[0], -1)
    y = jnp.einsum("nchw,oc->nohw", x_nchw, w)
    mean = jnp.mean(y, axis=(0, 2, 3), keepdims=True)
    var = jnp.mean((y - mean) ** 2, axis=(0, 2, 3), keepdims=True)      # biased
    y_hat = (y - mean) / jnp.sqrt(var + EPS)
    return y_hat * gamma.reshape(1, -1, 1, 1) + beta.reshape(1, -1, 1, 1)


def _check(x, w, gamma, beta, **kw):
    out = jax.block_until_ready(linear_block_forward(x, w, gamma, beta, **kw))
    ref = _reference(x, w, gamma, beta)
    assert out.shape == ref.shape, (out.shape, ref.shape)
    err = float(jnp.max(jnp.abs(out - ref)))
    assert jnp.allclose(out, ref, atol=2e-4, rtol=2e-4), err
    return out


if __name__ == "__main__":
    key = jax.random.PRNGKey(0)
    kx, kw, kg, kb, kx2 = jax.random.split(key, 5)

    # Linear_block(in_c=4, out_c=8, kernel=(1,1), stride=(1,1), padding=(0,0), groups=1)
    N, Cin, H, W, Cout = 2, 4, 16, 16, 8
    x = jax.random.normal(kx, (N, Cin, H, W), dtype=jnp.float32)
    w = 0.1 * jax.random.normal(kw, (Cout, Cin, 1, 1), dtype=jnp.float32)   # Conv2d 1x1 weight
    gamma = 1.0 + 0.1 * jax.random.normal(kg, (Cout,), dtype=jnp.float32)
    beta = 0.1 * jax.random.normal(kb, (Cout,), dtype=jnp.float32)

    # Fused single-call VMEM-resident path (default for small problems).
    _check(x, w, gamma, beta)
    # Two-pass tiled path with a multi-tile grid (tile_hw=128 -> 2 tiles per image).
    _check(x, w, gamma, beta, allow_fused=False, tile_hw=128)
    # Non-multiple-of-128 spatial size -> exercises in-kernel tail masking + padded output slab.
    x_odd = jax.random.normal(kx2, (N, Cin, 10, 10), dtype=jnp.float32)
    _check(x_odd, w, gamma, beta, allow_fused=False, tile_hw=128)
    _check(x_odd, w, gamma, beta)    # fused path on the odd shape too

    print("KERNEL_OK")
</pallas_src>

<mosaic_0001>
module attributes {stable_mosaic.version = 11 : i64} {
  func.func @_fused_kernel(%arg0: memref<2x4x256xf32, #tpu.memory_space<vmem>>, %arg1: memref<8x4xf32, #tpu.memory_space<vmem>>, %arg2: memref<1x8x1xf32, #tpu.memory_space<vmem>>, %arg3: memref<1x8x1xf32, #tpu.memory_space<vmem>>, %arg4: memref<2x8x256xf32, #tpu.memory_space<vmem>>) attributes {dimension_semantics = [], scalar_prefetch = 0 : i64, scratch_operands = 0 : i64, tpu.core_type = #tpu.core_type<tc>} {
    %c0 = arith.constant 0 : index
    %c0_0 = arith.constant 0 : index
    %c0_1 = arith.constant 0 : index
    %0 = vector.load %arg0[%c0, %c0_0, %c0_1] : memref<2x4x256xf32, #tpu.memory_space<vmem>>, vector<2x4x256xf32>
    %c0_2 = arith.constant 0 : index
    %c0_3 = arith.constant 0 : index
    %1 = vector.load %arg1[%c0_2, %c0_3] : memref<8x4xf32, #tpu.memory_space<vmem>>, vector<8x4xf32>
    %2 = vector.shape_cast %1 : vector<8x4xf32> to vector<1x8x4xf32>
    %3 = vector.broadcast %2 : vector<1x8x4xf32> to vector<2x8x4xf32>
    %cst = arith.constant dense<0.000000e+00> : vector<2x8x256xf32>
    %4 = tpu.matmul %3, %0, %cst {dimension_numbers = #tpu.dot_dimension_numbers<[2], [1], [1], [2], [0, 0, 0, 1, 1, 2], [0], [0]>} : vector<2x8x4xf32>, vector<2x4x256xf32>, vector<2x8x256xf32> -> vector<2x8x256xf32>
    %cst_4 = arith.constant dense<0.000000e+00> : vector<2x8xf32>
    %5 = vector.multi_reduction <add>, %4, %cst_4 [2] : vector<2x8x256xf32> to vector<2x8xf32>
    %6 = vector.shape_cast %5 : vector<2x8xf32> to vector<2x8x1xf32>
    %cst_5 = arith.constant dense<0.000000e+00> : vector<8x1xf32>
    %7 = vector.multi_reduction <add>, %6, %cst_5 [0] : vector<2x8x1xf32> to vector<8x1xf32>
    %8 = vector.shape_cast %7 : vector<8x1xf32> to vector<1x8x1xf32>
    %cst_6 = arith.constant 5.120000e+02 : f32
    %9 = vector.broadcast %cst_6 : f32 to vector<1x8x1xf32>
    %10 = arith.divf %8, %9 : vector<1x8x1xf32>
    %11 = vector.broadcast %10 : vector<1x8x1xf32> to vector<2x8x256xf32>
    %12 = arith.subf %4, %11 : vector<2x8x256xf32>
    %13 = arith.mulf %12, %12 : vector<2x8x256xf32>
    %cst_7 = arith.constant dense<0.000000e+00> : vector<2x8xf32>
    %14 = vector.multi_reduction <add>, %13, %cst_7 [2] : vector<2x8x256xf32> to vector<2x8xf32>
    %15 = vector.shape_cast %14 : vector<2x8xf32> to vector<2x8x1xf32>
    %cst_8 = arith.constant dense<0.000000e+00> : vector<8x1xf32>
    %16 = vector.multi_reduction <add>, %15, %cst_8 [0] : vector<2x8x1xf32> to vector<8x1xf32>
    %17 = vector.shape_cast %16 : vector<8x1xf32> to vector<1x8x1xf32>
    %cst_9 = arith.constant 5.120000e+02 : f32
    %18 = vector.broadcast %cst_9 : f32 to vector<1x8x1xf32>
    %19 = arith.divf %17, %18 : vector<1x8x1xf32>
    %cst_10 = arith.constant 9.99999974E-6 : f32
    %20 = vector.broadcast %cst_10 : f32 to vector<1x8x1xf32>
    %21 = arith.addf %19, %20 : vector<1x8x1xf32>
    %22 = math.rsqrt %21 : vector<1x8x1xf32>
    %c0_11 = arith.constant 0 : index
    %c0_12 = arith.constant 0 : index
    %c0_13 = arith.constant 0 : index
    %23 = vector.load %arg2[%c0_11, %c0_12, %c0_13] : memref<1x8x1xf32, #tpu.memory_space<vmem>>, vector<1x8x1xf32>
    %24 = arith.mulf %22, %23 : vector<1x8x1xf32>
    %25 = vector.broadcast %24 : vector<1x8x1xf32> to vector<2x8x256xf32>
    %26 = arith.mulf %12, %25 : vector<2x8x256xf32>
    %c0_14 = arith.constant 0 : index
    %c0_15 = arith.constant 0 : index
    %c0_16 = arith.constant 0 : index
    %27 = vector.load %arg3[%c0_14, %c0_15, %c0_16] : memref<1x8x1xf32, #tpu.memory_space<vmem>>, vector<1x8x1xf32>
    %28 = vector.broadcast %27 : vector<1x8x1xf32> to vector<2x8x256xf32>
    %29 = arith.addf %26, %28 : vector<2x8x256xf32>
    %c0_17 = arith.constant 0 : index
    %c0_18 = arith.constant 0 : index
    %c0_19 = arith.constant 0 : index
    %30 = vector.load %arg4[%c0_17, %c0_18, %c0_19] : memref<2x8x256xf32, #tpu.memory_space<vmem>>, vector<2x8x256xf32>
    tpu.vector_store %arg4[%c0_17, %c0_18, %c0_19], %29 {strides = array<i32>} : memref<2x8x256xf32, #tpu.memory_space<vmem>>, vector<2x8x256xf32>,
    return
  }
}

</mosaic_0001>

<bundles_post_ra>
// kernel: tpu_custom_call.1
= control target key start
LH: loop header
LB: loop body
LE: loop exit
PB: predicated region body
PF: predicated region fallthrough
CT: control target
= control target key end

     0   :  { %vm27_vm0 = vcmask 1043456   ;;  %v287_v3 = vmov 0.0   ;;  %s335_s0 = inlined_call_operand.vmem [shape: f32[2,4,256], index: 0, kind: input, shape index: {}]   ;;  %s336_s1 = inlined_call_operand.vmem [shape: f32[8,4], index: 1, kind: input, shape index: {}]   ;;  %s337_s2 = inlined_call_operand.vmem [shape: f32[1,8,1], index: 2, kind: input, shape index: {}]   ;;  %s338_s3 = inlined_call_operand.vmem [shape: f32[1,8,1], index: 3, kind: input, shape index: {}]   ;;  %s339_s4 = inlined_call_operand.hbm [shape: f32[2,8,256], index: 4, kind: output, shape index: {}]  }
   0x1   :  { %v18_v0 = vld [vmem:[%s335_s0] sm:$0xff]  ;;  %v19_v1 = vld [vmem:[%s335_s0 + $0x8] sm:$0xff]  ;;  %96 = vmatprep.mubr.f32.mxu0 %v287_v3  ;;  %173 = vmatprep.mubr.f32.mxu1 %v287_v3 }
   0x2   :  { %v22_v2 = vcombine.high %v18_v0, %v18_v0  ;;  %v104_v4 = vcombine.high %v19_v1, %v19_v1 }
   0x3   :  { %9 = vsyncpa [#allocation3], 0  ;;  %v20_v5 = vld [vmem:[%s336_s1] sm:$0xff]  ;;  %vm23_vm1 = vcmask 31744   ;;  %v288_v26 = vmov 0   ;;  %s289_s23 = smov [#allocation2]  }
   0x4   :  { %248 = vmatprep.subr.msk.mxu0 %vm27_vm0, %v22_v2  ;;  %251 = vmatprep.subr.msk.mxu1 %vm27_vm0, %v104_v4  ;;  %v218_v27 = vld [vmem:[%s338_s3] sm:$0xff]  ;;  %s237_s24 = sshll.u32 %s289_s23, 4  ;;  %s238_s24 = int_to_ptr.vmem [resolvable:$true] %s237_s24 }
   0x5   :  { %249 = vmatpush1.msk.msra.mxu0 %vm27_vm0, %v18_v0  ;;  %252 = vmatpush1.msk.msra.mxu1 %vm27_vm0, %v19_v1  ;;  %v207_v33 = vld [vmem:[%s337_s2] sm:$0xff]  ;;  %s265_s2 = scalar_lea.vmem %s238_s24, 512  ;;  %p270_p1 = scmp.lt.s32.totalorder %s238_s24, %s238_s24 }
   0x6   :  { %250 = vmatmul.mubr.msk.f32.vlgmr.msra.gmra.mxu0 %vm23_vm1, %v20_v5  ;;  %253 = vmatmul.mubr.msk.f32.vlgmr.msra.gmra.mxu1 %vm23_vm1, %v20_v5  ;;  %p266_p0 = scmp.ne.s32.totalorder %s238_s24, %s265_s2  ;;  %p271_p2 = scmp.lt.s32.totalorder %s265_s2, %s265_s2 }
   0x7   :  { %259 = vset.pattern.permute.xlu0 %v288_v26  ;;  %260 = vset.pattern.permute.xlu1 %v288_v26 }
   0x8   :  { %p272_p3 = por %p271_p2, %p270_p1 }
   0xa   :  { %p273_p4 = pnand %p272_p3, %p266_p0 }
  0xc6   :  { %v98_v6 = vpop.f32.mrf.mxu0  ;;  %v175_v7 = vpop.f32.mrf.mxu1 }
  0xc8   :  { %v100_v8 = vpop.f32.mrf.mxu0  ;;  %v177_v10 = vpop.f32.mrf.mxu1 }
  0xc9   :  { %v180_v9 = vadd.f32 %v100_v8, %v98_v6  ;;  %v183_v11 = vadd.f32 %v177_v10, %v175_v7 }
  0xcb   :  { %181 = vadd.xlane.f32.xlu0 %v180_v9 }
  0xcf   :  { %184 = vadd.xlane.f32.xlu0 %v183_v11 }
 0x154   :  { %v182_v12 = vpop.xlane.xlu0 %181 }
 0x158   :  { %v185_v13 = vpop.xlane.xlu0 %184 }
 0x159   :  { %v186_v14 = vadd.f32 %v185_v13, %v182_v12 }
 0x15b   :  { %v188_v15 = vmul.f32 0.001953125, %v186_v14 }
 0x15d   :  { %v189_v16 = vsub.f32 %v98_v6, %v188_v15  ;;  %v190_v17 = vsub.f32 %v100_v8, %v188_v15  ;;  %v191_v18 = vsub.f32 %v175_v7, %v188_v15  ;;  %v192_v19 = vsub.f32 %v177_v10, %v188_v15 }
 0x15f   :  { %v193_v20 = vmul.f32 %v189_v16, %v189_v16  ;;  %v194_v21 = vmul.f32 %v190_v17, %v190_v17  ;;  %v195_v23 = vmul.f32 %v191_v18, %v191_v18  ;;  %v196_v24 = vmul.f32 %v192_v19, %v192_v19 }
 0x161   :  { %v197_v22 = vadd.f32 %v194_v21, %v193_v20  ;;  %v200_v25 = vadd.f32 %v196_v24, %v195_v23 }
 0x163   :  { %198 = vadd.xlane.f32.xlu1 %v197_v22 }
 0x167   :  { %201 = vadd.xlane.f32.xlu1 %v200_v25 }
 0x178   :  { %221 = vperm.xlu1 %260, %v218_v27  }
 0x1ec   :  { %v199_v28 = vpop.xlane.xlu1 %198 }
 0x1f0   :  { %v202_v29 = vpop.xlane.xlu1 %201 }
 0x1f1   :  { %v203_v30 = vadd.f32 %v202_v29, %v199_v28 }
 0x1f3   :  { %v204_v31 = vmul.f32 0.001953125, %v203_v30 }
 0x1f4   :  { %v222_v37 = vpop.permute.xlu1 %221 }
 0x1f5   :  { %v205_v32 = vadd.f32 1e-05, %v204_v31 }
 0x1f7   :  { %263 = vrsqrt.f32 %v205_v32 }
 0x204   :  { %v264_v34 = vpop.eup %263 }
 0x205   :  { %v208_v35 = vmul.f32 %v264_v34, %v207_v33 }
 0x207   :  { %211 = vperm.xlu0 %259, %v208_v35  }
 0x282   :  { %v212_v36 = vpop.permute.xlu0 %211 }
 0x283   :  { %v214_v38 = vmul.f32 %v212_v36, %v189_v16  ;;  %v215_v39 = vmul.f32 %v212_v36, %v190_v17  ;;  %v216_v40 = vmul.f32 %v212_v36, %v191_v18  ;;  %v217_v41 = vmul.f32 %v212_v36, %v192_v19 }
 0x285   :  { %v224_v42 = vadd.f32 %v222_v37, %v214_v38  ;;  %v225_v43 = vadd.f32 %v222_v37, %v215_v39  ;;  %v226_v44 = vadd.f32 %v222_v37, %v216_v40  ;;  %v227_v45 = vadd.f32 %v222_v37, %v217_v41 }
 0x287   :  { %228 = vst [vmem:[#allocation2] sm:$0xff] %v224_v42  ;;  %229 = vst [vmem:[#allocation2 + $0x8] sm:$0xff] %v225_v43 }
 0x288   :  { %230 = vst [vmem:[#allocation2 + $0x10] sm:$0xff] %v226_v44  ;;  %231 = vst [vmem:[#allocation2 + $0x18] sm:$0xff] %v227_v45 }
 0x289   :  { %276 = shalt.err (!%p273_p4)
}
 0x28a   :  { %s290_s3 = smov 256   ;;  %s291_s25 = smov 16  }
 0x28b   :  { %243 = dma.vmem_to_hbm [thread:$0]  %s238_s24, 512, %s339_s4, [#allocation3], %s290_s3, %s290_s3, %s291_s25  }
 0x28c   :  { %285 = dma.done.wait [#allocation3], 512  }
 0x28d   :  { %286 = vsyncadd [#allocation3], 4294966784 }
 0x28e   :  { %247 = vsyncpa [#allocation3], 1 }

</bundles_post_ra>
